<compile_context>
chip_gen: v7x
topology: tpu7x:2x2x1
jax: 0.10.0
libtpu: 0.0.40
codegen_flags: <defaults>
</compile_context>

<pallas_src>
import functools

import jax
import jax.numpy as jnp
from jax import lax
from jax.experimental import pallas as pl
from jax.experimental.pallas import tpu as pltpu

BN_EPS = 1e-5


# ----------------------------------------------------------------------------
# helpers
# ----------------------------------------------------------------------------
def _round_up(a, m):
    return (a + m - 1) // m * m


@functools.lru_cache(maxsize=None)
def _vmem_limit_bytes():
    """Per-TensorCore-safe scoped-VMEM budget.

    get_tpu_info may report chip-level capacity (2 TCs on v7x share 128 MiB), so clamp
    to a conservative per-core number: 48 MiB on 128 MiB parts, 24 MiB on 64 MiB parts.
    """
    try:
        cap = int(pltpu.get_tpu_info().vmem_capacity_bytes)
    except Exception:
        cap = 64 << 20
    return max(16 << 20, min(48 << 20, (cap * 3) // 8))


def _choose_tm(m_valid, K, C, x_bytes, store_bytes, mxu_bytes, vmem_limit):
    """Largest row tile whose double-buffered working set fits the VMEM budget,
    capped so the grid keeps >= ~4 steps (megacore sharding on v7x + DMA overlap)."""
    budget = (vmem_limit * 3) // 4
    tm = 8
    for cand in (2048, 1024, 512, 256, 128, 64, 32, 16, 8):
        need = (2 * cand * K * x_bytes          # input tile (double buffered)
                + 2 * cand * C * store_bytes    # y output tile (double buffered)
                + 2 * 8 * C * 4                 # stats output tile
                + 2 * K * C * mxu_bytes         # resident weight
                + cand * (K + 2 * C) * 4        # in-kernel f32 temporaries
                + (2 << 20))                    # headroom
        if need <= budget:
            tm = cand
            break
    grid_cap = max(8, _round_up((m_valid + 3) // 4, 8))
    return max(8, min(tm, grid_cap))


def _bn_fold(mean, var, gamma, beta):
    """Fold train-mode BatchNorm into one scale/shift per channel (tiny (C,) vectors)."""
    scale = gamma.astype(jnp.float32) * lax.rsqrt(var + BN_EPS)
    shift = beta.astype(jnp.float32) - mean * scale
    return scale, shift


# ----------------------------------------------------------------------------
# Pallas kernels (pass A: GEMM + exact per-tile BN statistics)
# ----------------------------------------------------------------------------
def _gemm_stats_kernel(x_ref, w_ref, y_ref, stats_ref, *, mxu_dtype):
    """y = x @ w (no bias; it cancels through BN) + per-tile column sum / sum-of-squares.

    Zero-padded rows of x contribute exactly zero to both sums, so no row mask is needed.
    Only stats rows 0 (sum) and 1 (sum of squares) are written; rows 2..7 are unused.
    """
    y = jnp.dot(x_ref[...].astype(mxu_dtype), w_ref[...],
                preferred_element_type=jnp.float32)
    y_ref[...] = y.astype(y_ref.dtype)
    stats_ref[0:1, :] = jnp.sum(y, axis=0, keepdims=True)
    stats_ref[1:2, :] = jnp.sum(y * y, axis=0, keepdims=True)


def _act_gemm_stats_kernel(yprev_ref, scale_ref, shift_ref, w_ref, y_ref, stats_ref,
                           *, tm, m_valid, needs_mask, mxu_dtype):
    """Previous layer's BN+ReLU epilogue fused as a prologue, then GEMM + statistics.

    a = relu(y_prev * scale + shift); padded rows (zero y_prev -> relu(shift) != 0) are
    masked back to zero when the row axis carries padding so the stats stay exact.
    """
    a = yprev_ref[...].astype(jnp.float32) * scale_ref[...] + shift_ref[...]
    a = jnp.maximum(a, 0.0)
    if needs_mask:
        row = pl.program_id(0) * tm + lax.broadcasted_iota(jnp.int32, (tm, 1), 0)
        a = jnp.where(row < m_valid, a, 0.0)
    y = jnp.dot(a.astype(mxu_dtype), w_ref[...], preferred_element_type=jnp.float32)
    y_ref[...] = y.astype(y_ref.dtype)
    stats_ref[0:1, :] = jnp.sum(y, axis=0, keepdims=True)
    stats_ref[1:2, :] = jnp.sum(y * y, axis=0, keepdims=True)


# ----------------------------------------------------------------------------
# row-tiled GEMM + exact train-mode BN statistics
# ----------------------------------------------------------------------------
def gemm_bn_stats(x2d, w, *, mxu_dtype, store_dtype, tm=None,
                  prev_scale=None, prev_shift=None, m_valid=None):
    """y = prologue(x2d) @ w, plus per-column mean / (biased) variance over m_valid rows.

    prologue(x) = relu(x * prev_scale + prev_shift) when prev_scale is given (the previous
    layer's folded BN+ReLU epilogue), identity otherwise.  Returns
    (y_pad (M_pad, C) in store_dtype, mean (C,) f32, var (C,) f32); the statistics are
    taken from the f32 MXU accumulator *before* the store_dtype downcast.
    """
    M_in, K = x2d.shape
    C = w.shape[1]
    f32 = jnp.float32
    mxu_dtype = jnp.dtype(mxu_dtype)
    store_dtype = jnp.dtype(store_dtype)
    if m_valid is None:
        m_valid = M_in

    vmem_limit = _vmem_limit_bytes()
    if tm is None:
        tm = _choose_tm(m_valid, K, C, x2d.dtype.itemsize, store_dtype.itemsize,
                        mxu_dtype.itemsize, vmem_limit)
    M_pad = _round_up(M_in, tm)
    grid_m = M_pad // tm
    if M_pad != M_in:
        x2d = jnp.pad(x2d, ((0, M_pad - M_in), (0, 0)))
    wp = w.astype(mxu_dtype)

    if prev_scale is not None:
        needs_mask = M_pad != m_valid
        kernel = functools.partial(_act_gemm_stats_kernel, tm=tm, m_valid=m_valid,
                                   needs_mask=needs_mask, mxu_dtype=mxu_dtype)
        args = (x2d, prev_scale.astype(f32).reshape(1, K),
                prev_shift.astype(f32).reshape(1, K), wp)
        in_specs = [
            pl.BlockSpec((tm, K), lambda i: (i, 0)),
            pl.BlockSpec((1, K), lambda i: (0, 0)),
            pl.BlockSpec((1, K), lambda i: (0, 0)),
            pl.BlockSpec((K, C), lambda i: (0, 0)),
        ]
    else:
        kernel = functools.partial(_gemm_stats_kernel, mxu_dtype=mxu_dtype)
        args = (x2d, wp)
        in_specs = [
            pl.BlockSpec((tm, K), lambda i: (i, 0)),
            pl.BlockSpec((K, C), lambda i: (0, 0)),
        ]

    y_pad, stats_part = pl.pallas_call(
        kernel,
        grid=(grid_m,),
        in_specs=in_specs,
        out_specs=[
            pl.BlockSpec((tm, C), lambda i: (i, 0)),
            pl.BlockSpec((8, C), lambda i: (i, 0)),
        ],
        out_shape=[
            jax.ShapeDtypeStruct((M_pad, C), store_dtype),
            jax.ShapeDtypeStruct((grid_m * 8, C), f32),
        ],
        compiler_params=pltpu.CompilerParams(
            dimension_semantics=("parallel",),
            vmem_limit_bytes=vmem_limit),
    )(*args)

    # Tiny cross-tile reduction of the per-tile partial statistics (rows 2..7 are unused).
    stats = stats_part.reshape(grid_m, 8, C)[:, 0:2, :].sum(axis=0)
    mean = stats[0] / float(m_valid)
    var = jnp.maximum(stats[1] / float(m_valid) - mean * mean, 0.0)
    return y_pad, mean, var


# ----------------------------------------------------------------------------
# ConvTranspose2d(3x3, stride, padding=1, output_padding) as a forward GEMM operand.
# The stride-dilation + padding are folded into static index math, so the dilated/padded
# intermediate is never materialized.  Patches are built in the MXU dtype (bf16 in prod).
# ----------------------------------------------------------------------------
def _tap_span(off, in_len, out_len, s):
    """Output positions o = s*i + off for the valid input range [i0, i0+n)."""
    i0 = max(0, (-off + s - 1) // s)
    i1 = min(in_len - 1, (out_len - 1 - off) // s)   # inclusive
    n = i1 - i0 + 1
    return i0, s * i0 + off, max(n, 0)


def _conv_transpose_patches(y, w_t, stride, padding, output_padding):
    N, H, W, C = y.shape
    k = 3
    s, p, op = stride, padding, output_padding
    Ho = (H - 1) * s - 2 * p + k + op
    Wo = (W - 1) * s - 2 * p + k + op
    lo = k - 1 - p

    cols = jnp.zeros((N, Ho, Wo, k * k, C), y.dtype)
    for kh in range(k):
        ih0, oh0, nh = _tap_span(lo - kh, H, Ho, s)
        for kw in range(k):
            iw0, ow0, nw = _tap_span(lo - kw, W, Wo, s)
            if nh <= 0 or nw <= 0:
                continue
            t = kh * k + kw
            cols = cols.at[:, oh0:oh0 + s * nh:s, ow0:ow0 + s * nw:s, t, :].set(
                y[:, ih0:ih0 + nh, iw0:iw0 + nw, :])

    xcol = cols.reshape(N * Ho * Wo, k * k * C)
    # equivalent forward-conv weight: flip the kernel, rows ordered (kh, kw, cin)
    w_eq = jnp.transpose(w_t[:, :, ::-1, ::-1], (2, 3, 0, 1)).reshape(k * k * C, w_t.shape[1])
    return xcol, w_eq, Ho, Wo


# ----------------------------------------------------------------------------
# Decoder forward (Pallas)
# ----------------------------------------------------------------------------
def decoder_forward(x_nchw, params, stride, output_padding, mxu_dtype=jnp.bfloat16):
    mxu_dtype = jnp.dtype(mxu_dtype)
    f32 = jnp.float32

    x = jnp.transpose(x_nchw, (0, 2, 3, 1))                     # NCHW -> NHWC
    N, H, W, Cin = x.shape
    mid = Cin // 4
    M1 = N * H * W

    # ---- layer 1: 1x1 conv (bias cancels through BN) -> raw y1 + exact stats ----------
    y1_pad, mean1, var1 = gemm_bn_stats(x.reshape(M1, Cin), params["w1"],
                                        mxu_dtype=mxu_dtype, store_dtype=mxu_dtype)
    scale1, shift1 = _bn_fold(mean1, var1, params["g1"], params["beta1"])
    # Layer-1 BN+ReLU epilogue applied in XLA, fused into the im2col gather below.
    y1_act = jnp.maximum(y1_pad[:M1].astype(f32) * scale1 + shift1, 0.0)
    y1_act = y1_act.astype(mxu_dtype).reshape(N, H, W, mid)

    # ---- layer 2: ConvTranspose2d 3x3 as a forward GEMM over 9-tap patches ------------
    xcol, w_eq, Ho, Wo = _conv_transpose_patches(y1_act, params["wt"], stride, 1,
                                                 output_padding)
    M2 = N * Ho * Wo
    # One tile size for layers 2 & 3 so the raw y2 feeds layer 3 without re-padding.
    tm23 = _choose_tm(M2, xcol.shape[1], mid, mxu_dtype.itemsize, mxu_dtype.itemsize,
                      mxu_dtype.itemsize, _vmem_limit_bytes())
    y2_pad, mean2, var2 = gemm_bn_stats(xcol, w_eq, mxu_dtype=mxu_dtype,
                                        store_dtype=mxu_dtype, tm=tm23)
    scale2, shift2 = _bn_fold(mean2, var2, params["g2"], params["beta2"])

    # ---- layer 3: 1x1 conv with layer-2's BN+ReLU fused in as an in-kernel prologue ---
    y3_pad, mean3, var3 = gemm_bn_stats(y2_pad, params["w3"], mxu_dtype=mxu_dtype,
                                        store_dtype=mxu_dtype, tm=tm23,
                                        prev_scale=scale2, prev_shift=shift2,
                                        m_valid=M2)
    scale3, shift3 = _bn_fold(mean3, var3, params["g3"], params["beta3"])

    # Final BN+ReLU epilogue fused (in XLA) with the slice / reshape / NHWC->NCHW transpose.
    Cout = params["w3"].shape[1]
    out = jnp.maximum(y3_pad[:M2].astype(f32) * scale3 + shift3, 0.0)
    out = out.reshape(N, Ho, Wo, Cout)
    return jnp.transpose(out, (0, 3, 1, 2))                      # NHWC -> NCHW


# ----------------------------------------------------------------------------
# Pure-JAX reference (mirrors the PyTorch module, training-mode BatchNorm, with biases).
# `operand_dtype` mirrors the kernel's bf16 MXU-operand quantization.
# ----------------------------------------------------------------------------
def decoder_reference(x_nchw, params, stride, output_padding, operand_dtype=jnp.float32):
    dn = ("NCHW", "OIHW", "NCHW")

    def conv(lhs, rhs, window_strides, padding, lhs_dilation=None):
        return lax.conv_general_dilated(
            lhs.astype(operand_dtype), rhs.astype(operand_dtype),
            window_strides, padding, lhs_dilation=lhs_dilation,
            dimension_numbers=dn, preferred_element_type=jnp.float32)

    def bn_relu(y, g, b):
        mean = jnp.mean(y, axis=(0, 2, 3), keepdims=True)
        var = jnp.mean(jnp.square(y - mean), axis=(0, 2, 3), keepdims=True)
        yh = (y - mean) / jnp.sqrt(var + BN_EPS)
        return jnp.maximum(yh * g.reshape(1, -1, 1, 1) + b.reshape(1, -1, 1, 1), 0.0)

    Cin = x_nchw.shape[1]
    mid = Cin // 4
    w1_oihw = jnp.transpose(params["w1"], (1, 0)).reshape(mid, Cin, 1, 1)
    y = conv(x_nchw, w1_oihw, (1, 1), "VALID")
    y = bn_relu(y + params["b1"].reshape(1, -1, 1, 1), params["g1"], params["beta1"])

    op = output_padding
    w_conv = jnp.transpose(params["wt"][:, :, ::-1, ::-1], (1, 0, 2, 3))
    y = conv(y, w_conv, (1, 1), ((1, 1 + op), (1, 1 + op)), lhs_dilation=(stride, stride))
    y = bn_relu(y + params["b2"].reshape(1, -1, 1, 1), params["g2"], params["beta2"])

    Cout = params["w3"].shape[1]
    w3_oihw = jnp.transpose(params["w3"], (1, 0)).reshape(Cout, mid, 1, 1)
    y = conv(y, w3_oihw, (1, 1), "VALID")
    y = bn_relu(y + params["b3"].reshape(1, -1, 1, 1), params["g3"], params["beta3"])
    return y


# ----------------------------------------------------------------------------
def init_params(key, in_channels, out_channels):
    mid = in_channels // 4
    ks = jax.random.split(key, 12)
    return {
        "w1": 0.2 * jax.random.normal(ks[0], (in_channels, mid), jnp.float32),
        "b1": 0.1 * jax.random.normal(ks[1], (mid,), jnp.float32),
        "g1": 1.0 + 0.1 * jax.random.normal(ks[2], (mid,), jnp.float32),
        "beta1": 0.1 * jax.random.normal(ks[3], (mid,), jnp.float32),
        # ConvTranspose2d weight, torch layout (in, out, kh, kw)
        "wt": 0.2 * jax.random.normal(ks[4], (mid, mid, 3, 3), jnp.float32),
        "b2": 0.1 * jax.random.normal(ks[5], (mid,), jnp.float32),
        "g2": 1.0 + 0.1 * jax.random.normal(ks[6], (mid,), jnp.float32),
        "beta2": 0.1 * jax.random.normal(ks[7], (mid,), jnp.float32),
        "w3": 0.2 * jax.random.normal(ks[8], (mid, out_channels), jnp.float32),
        "b3": 0.1 * jax.random.normal(ks[9], (out_channels,), jnp.float32),
        "g3": 1.0 + 0.1 * jax.random.normal(ks[10], (out_channels,), jnp.float32),
        "beta3": 0.1 * jax.random.normal(ks[11], (out_channels,), jnp.float32),
    }


if __name__ == "__main__":
    N, Cin, Cout, H, W = 2, 16, 8, 8, 8
    stride, output_padding = 2, 1

    key = jax.random.PRNGKey(0)
    k_x, k_p = jax.random.split(key)
    x = jax.random.normal(k_x, (N, Cin, H, W), jnp.float32)       # NCHW, like PyTorch
    params = init_params(k_p, Cin, Cout)

    Ho = (H - 1) * stride - 2 * 1 + 3 + output_padding
    Wo = (W - 1) * stride - 2 * 1 + 3 + output_padding

    fwd_f32 = jax.jit(functools.partial(
        decoder_forward, stride=stride, output_padding=output_padding,
        mxu_dtype=jnp.float32))
    fwd_bf16 = jax.jit(functools.partial(
        decoder_forward, stride=stride, output_padding=output_padding,
        mxu_dtype=jnp.bfloat16))

    # 1) Exact-semantics check: f32 operands / f32 intermediates vs. the f32 reference
    #    (also demonstrates that dropping the conv biases is exact through train-mode BN).
    out = jax.block_until_ready(fwd_f32(x, params))
    ref = jax.block_until_ready(decoder_reference(x, params, stride, output_padding))
    assert out.shape == (N, Cout, Ho, Wo), (out.shape, (N, Cout, Ho, Wo))
    err = float(jnp.max(jnp.abs(out - ref)))
    assert jnp.allclose(out, ref, atol=1e-3, rtol=1e-3), err

    # 2) Production path: bf16 MXU operands AND bf16 HBM intermediates (f32 accumulation,
    #    f32 statistics / BN math), checked against a reference that applies the same
    #    operand quantization.  Tolerance covers the extra bf16 rounding of the stored
    #    intermediates through 3 layers.
    out_bf = jax.block_until_ready(fwd_bf16(x, params))
    ref_bf = jax.block_until_ready(
        decoder_reference(x, params, stride, output_padding, operand_dtype=jnp.bfloat16))
    err_bf = float(jnp.max(jnp.abs(out_bf - ref_bf)))
    assert jnp.allclose(out_bf, ref_bf, atol=3e-2, rtol=3e-2), err_bf

    print("KERNEL_OK")
</pallas_src>

<mosaic_0001>
module attributes {stable_mosaic.version = 11 : i64} {
  func.func @_gemm_stats_kernel(%arg0: i32, %arg1: memref<32x16xf32, #tpu.memory_space<vmem>>, %arg2: memref<16x4xf32, #tpu.memory_space<vmem>>, %arg3: memref<32x4xf32, #tpu.memory_space<vmem>>, %arg4: memref<8x4xf32, #tpu.memory_space<vmem>>) attributes {dimension_semantics = [#tpu.dimension_semantics<parallel>], iteration_bounds = array<i64: 4>, scalar_prefetch = 0 : i64, scratch_operands = 0 : i64, tpu.core_type = #tpu.core_type<tc>, window_params = [{transform_indices = @transform_0, window_bounds = array<i64: 32, 16>}, {pipeline_mode = #tpu.pipeline_mode<synchronous>, transform_indices = @transform_1, window_bounds = array<i64: 16, 4>}, {transform_indices = @transform_2, window_bounds = array<i64: 32, 4>}, {transform_indices = @transform_3, window_bounds = array<i64: 8, 4>}]} {
    %c0 = arith.constant 0 : index
    %c0_0 = arith.constant 0 : index
    %0 = vector.load %arg1[%c0, %c0_0] : memref<32x16xf32, #tpu.memory_space<vmem>>, vector<32x16xf32>
    %c0_1 = arith.constant 0 : index
    %c0_2 = arith.constant 0 : index
    %1 = vector.load %arg2[%c0_1, %c0_2] : memref<16x4xf32, #tpu.memory_space<vmem>>, vector<16x4xf32>
    %cst = arith.constant dense<0.000000e+00> : vector<32x4xf32>
    %2 = tpu.matmul %0, %1, %cst {dimension_numbers = #tpu.dot_dimension_numbers<[1], [0], [0], [1], [0, 0, 1, 1], [], []>} : vector<32x16xf32>, vector<16x4xf32>, vector<32x4xf32> -> vector<32x4xf32>
    %c0_3 = arith.constant 0 : index
    %c0_4 = arith.constant 0 : index
    %3 = vector.load %arg3[%c0_3, %c0_4] : memref<32x4xf32, #tpu.memory_space<vmem>>, vector<32x4xf32>
    tpu.vector_store %arg3[%c0_3, %c0_4], %2 {strides = array<i32>} : memref<32x4xf32, #tpu.memory_space<vmem>>, vector<32x4xf32>,
    %cst_5 = arith.constant dense<0.000000e+00> : vector<4xf32>
    %4 = vector.multi_reduction <add>, %2, %cst_5 [0] : vector<32x4xf32> to vector<4xf32>
    %5 = vector.shape_cast %4 : vector<4xf32> to vector<1x4xf32>
    %c0_6 = arith.constant 0 : index
    %c0_7 = arith.constant 0 : index
    %6 = vector.load %arg4[%c0_6, %c0_7] : memref<8x4xf32, #tpu.memory_space<vmem>>, vector<1x4xf32>
    tpu.vector_store %arg4[%c0_6, %c0_7], %5 {strides = array<i32>} : memref<8x4xf32, #tpu.memory_space<vmem>>, vector<1x4xf32>,
    %7 = arith.mulf %2, %2 : vector<32x4xf32>
    %cst_8 = arith.constant dense<0.000000e+00> : vector<4xf32>
    %8 = vector.multi_reduction <add>, %7, %cst_8 [0] : vector<32x4xf32> to vector<4xf32>
    %9 = vector.shape_cast %8 : vector<4xf32> to vector<1x4xf32>
    %c1 = arith.constant 1 : index
    %c0_9 = arith.constant 0 : index
    %10 = vector.load %arg4[%c1, %c0_9] : memref<8x4xf32, #tpu.memory_space<vmem>>, vector<1x4xf32>
    tpu.vector_store %arg4[%c1, %c0_9], %9 {strides = array<i32>} : memref<8x4xf32, #tpu.memory_space<vmem>>, vector<1x4xf32>,
    return
  }
  func.func @transform_0(%arg0: i32) -> (i32, i32) {
    %c0_i32 = arith.constant 0 : i32
    %c0_i32_0 = arith.constant 0 : i32
    return %arg0, %c0_i32 : i32, i32
  }
  func.func @transform_1(%arg0: i32) -> (i32, i32) {
    %c0_i32 = arith.constant 0 : i32
    %c0_i32_0 = arith.constant 0 : i32
    %c0_i32_1 = arith.constant 0 : i32
    return %c0_i32, %c0_i32_0 : i32, i32
  }
  func.func @transform_2(%arg0: i32) -> (i32, i32) {
    %c0_i32 = arith.constant 0 : i32
    %c0_i32_0 = arith.constant 0 : i32
    return %arg0, %c0_i32 : i32, i32
  }
  func.func @transform_3(%arg0: i32) -> (i32, i32) {
    %c0_i32 = arith.constant 0 : i32
    %c0_i32_0 = arith.constant 0 : i32
    return %arg0, %c0_i32 : i32, i32
  }
}

module attributes {stable_mosaic.version = 11 : i64} {
  func.func @_gemm_stats_kernel(%arg0: i32, %arg1: memref<128x36xf32, #tpu.memory_space<vmem>>, %arg2: memref<36x4xf32, #tpu.memory_space<vmem>>, %arg3: memref<128x4xf32, #tpu.memory_space<vmem>>, %arg4: memref<8x4xf32, #tpu.memory_space<vmem>>) attributes {dimension_semantics = [#tpu.dimension_semantics<parallel>], iteration_bounds = array<i64: 4>, scalar_prefetch = 0 : i64, scratch_operands = 0 : i64, tpu.core_type = #tpu.core_type<tc>, window_params = [{transform_indices = @transform_0, window_bounds = array<i64: 128, 36>}, {pipeline_mode = #tpu.pipeline_mode<synchronous>, transform_indices = @transform_1, window_bounds = array<i64: 36, 4>}, {transform_indices = @transform_2, window_bounds = array<i64: 128, 4>}, {transform_indices = @transform_3, window_bounds = array<i64: 8, 4>}]} {
    %c0 = arith.constant 0 : index
    %c0_0 = arith.constant 0 : index
    %0 = vector.load %arg1[%c0, %c0_0] : memref<128x36xf32, #tpu.memory_space<vmem>>, vector<128x36xf32>
    %c0_1 = arith.constant 0 : index
    %c0_2 = arith.constant 0 : index
    %1 = vector.load %arg2[%c0_1, %c0_2] : memref<36x4xf32, #tpu.memory_space<vmem>>, vector<36x4xf32>
    %cst = arith.constant dense<0.000000e+00> : vector<128x4xf32>
    %2 = tpu.matmul %0, %1, %cst {dimension_numbers = #tpu.dot_dimension_numbers<[1], [0], [0], [1], [0, 0, 1, 1], [], []>} : vector<128x36xf32>, vector<36x4xf32>, vector<128x4xf32> -> vector<128x4xf32>
    %c0_3 = arith.constant 0 : index
    %c0_4 = arith.constant 0 : index
    %3 = vector.load %arg3[%c0_3, %c0_4] : memref<128x4xf32, #tpu.memory_space<vmem>>, vector<128x4xf32>
    tpu.vector_store %arg3[%c0_3, %c0_4], %2 {strides = array<i32>} : memref<128x4xf32, #tpu.memory_space<vmem>>, vector<128x4xf32>,
    %cst_5 = arith.constant dense<0.000000e+00> : vector<4xf32>
    %4 = vector.multi_reduction <add>, %2, %cst_5 [0] : vector<128x4xf32> to vector<4xf32>
    %5 = vector.shape_cast %4 : vector<4xf32> to vector<1x4xf32>
    %c0_6 = arith.constant 0 : index
    %c0_7 = arith.constant 0 : index
    %6 = vector.load %arg4[%c0_6, %c0_7] : memref<8x4xf32, #tpu.memory_space<vmem>>, vector<1x4xf32>
    tpu.vector_store %arg4[%c0_6, %c0_7], %5 {strides = array<i32>} : memref<8x4xf32, #tpu.memory_space<vmem>>, vector<1x4xf32>,
    %7 = arith.mulf %2, %2 : vector<128x4xf32>
    %cst_8 = arith.constant dense<0.000000e+00> : vector<4xf32>
    %8 = vector.multi_reduction <add>, %7, %cst_8 [0] : vector<128x4xf32> to vector<4xf32>
    %9 = vector.shape_cast %8 : vector<4xf32> to vector<1x4xf32>
    %c1 = arith.constant 1 : index
    %c0_9 = arith.constant 0 : index
    %10 = vector.load %arg4[%c1, %c0_9] : memref<8x4xf32, #tpu.memory_space<vmem>>, vector<1x4xf32>
    tpu.vector_store %arg4[%c1, %c0_9], %9 {strides = array<i32>} : memref<8x4xf32, #tpu.memory_space<vmem>>, vector<1x4xf32>,
    return
  }
  func.func @transform_0(%arg0: i32) -> (i32, i32) {
    %c0_i32 = arith.constant 0 : i32
    %c0_i32_0 = arith.constant 0 : i32
    return %arg0, %c0_i32 : i32, i32
  }
  func.func @transform_1(%arg0: i32) -> (i32, i32) {
    %c0_i32 = arith.constant 0 : i32
    %c0_i32_0 = arith.constant 0 : i32
    %c0_i32_1 = arith.constant 0 : i32
    return %c0_i32, %c0_i32_0 : i32, i32
  }
  func.func @transform_2(%arg0: i32) -> (i32, i32) {
    %c0_i32 = arith.constant 0 : i32
    %c0_i32_0 = arith.constant 0 : i32
    return %arg0, %c0_i32 : i32, i32
  }
  func.func @transform_3(%arg0: i32) -> (i32, i32) {
    %c0_i32 = arith.constant 0 : i32
    %c0_i32_0 = arith.constant 0 : i32
    return %arg0, %c0_i32 : i32, i32
  }
}

module attributes {stable_mosaic.version = 11 : i64} {
  func.func @_act_gemm_stats_kernel(%arg0: i32, %arg1: memref<128x4xf32, #tpu.memory_space<vmem>>, %arg2: memref<1x4xf32, #tpu.memory_space<vmem>>, %arg3: memref<1x4xf32, #tpu.memory_space<vmem>>, %arg4: memref<4x8xf32, #tpu.memory_space<vmem>>, %arg5: memref<128x8xf32, #tpu.memory_space<vmem>>, %arg6: memref<8x8xf32, #tpu.memory_space<vmem>>) attributes {dimension_semantics = [#tpu.dimension_semantics<parallel>], iteration_bounds = array<i64: 4>, scalar_prefetch = 0 : i64, scratch_operands = 0 : i64, tpu.core_type = #tpu.core_type<tc>, window_params = [{transform_indices = @transform_0, window_bounds = array<i64: 128, 4>}, {pipeline_mode = #tpu.pipeline_mode<synchronous>, transform_indices = @transform_1, window_bounds = array<i64: 1, 4>}, {pipeline_mode = #tpu.pipeline_mode<synchronous>, transform_indices = @transform_2, window_bounds = array<i64: 1, 4>}, {pipeline_mode = #tpu.pipeline_mode<synchronous>, transform_indices = @transform_3, window_bounds = array<i64: 4, 8>}, {transform_indices = @transform_4, window_bounds = array<i64: 128, 8>}, {transform_indices = @transform_5, window_bounds = array<i64: 8, 8>}]} {
    %c0 = arith.constant 0 : index
    %c0_0 = arith.constant 0 : index
    %0 = vector.load %arg1[%c0, %c0_0] : memref<128x4xf32, #tpu.memory_space<vmem>>, vector<128x4xf32>
    %c0_1 = arith.constant 0 : index
    %c0_2 = arith.constant 0 : index
    %1 = vector.load %arg2[%c0_1, %c0_2] : memref<1x4xf32, #tpu.memory_space<vmem>>, vector<1x4xf32>
    %2 = vector.broadcast %1 : vector<1x4xf32> to vector<128x4xf32>
    %3 = arith.mulf %0, %2 : vector<128x4xf32>
    %c0_3 = arith.constant 0 : index
    %c0_4 = arith.constant 0 : index
    %4 = vector.load %arg3[%c0_3, %c0_4] : memref<1x4xf32, #tpu.memory_space<vmem>>, vector<1x4xf32>
    %5 = vector.broadcast %4 : vector<1x4xf32> to vector<128x4xf32>
    %6 = arith.addf %3, %5 : vector<128x4xf32>
    %cst = arith.constant 0.000000e+00 : f32
    %7 = vector.broadcast %cst : f32 to vector<128x4xf32>
    %8 = arith.maximumf %6, %7 : vector<128x4xf32>
    %c0_5 = arith.constant 0 : index
    %c0_6 = arith.constant 0 : index
    %9 = vector.load %arg4[%c0_5, %c0_6] : memref<4x8xf32, #tpu.memory_space<vmem>>, vector<4x8xf32>
    %cst_7 = arith.constant dense<0.000000e+00> : vector<128x8xf32>
    %10 = tpu.matmul %8, %9, %cst_7 {dimension_numbers = #tpu.dot_dimension_numbers<[1], [0], [0], [1], [0, 0, 1, 1], [], []>} : vector<128x4xf32>, vector<4x8xf32>, vector<128x8xf32> -> vector<128x8xf32>
    %c0_8 = arith.constant 0 : index
    %c0_9 = arith.constant 0 : index
    %11 = vector.load %arg5[%c0_8, %c0_9] : memref<128x8xf32, #tpu.memory_space<vmem>>, vector<128x8xf32>
    tpu.vector_store %arg5[%c0_8, %c0_9], %10 {strides = array<i32>} : memref<128x8xf32, #tpu.memory_space<vmem>>, vector<128x8xf32>,
    %cst_10 = arith.constant dense<0.000000e+00> : vector<8xf32>
    %12 = vector.multi_reduction <add>, %10, %cst_10 [0] : vector<128x8xf32> to vector<8xf32>
    %13 = vector.shape_cast %12 : vector<8xf32> to vector<1x8xf32>
    %c0_11 = arith.constant 0 : index
    %c0_12 = arith.constant 0 : index
    %14 = vector.load %arg6[%c0_11, %c0_12] : memref<8x8xf32, #tpu.memory_space<vmem>>, vector<1x8xf32>
    tpu.vector_store %arg6[%c0_11, %c0_12], %13 {strides = array<i32>} : memref<8x8xf32, #tpu.memory_space<vmem>>, vector<1x8xf32>,
    %15 = arith.mulf %10, %10 : vector<128x8xf32>
    %cst_13 = arith.constant dense<0.000000e+00> : vector<8xf32>
    %16 = vector.multi_reduction <add>, %15, %cst_13 [0] : vector<128x8xf32> to vector<8xf32>
    %17 = vector.shape_cast %16 : vector<8xf32> to vector<1x8xf32>
    %c1 = arith.constant 1 : index
    %c0_14 = arith.constant 0 : index
    %18 = vector.load %arg6[%c1, %c0_14] : memref<8x8xf32, #tpu.memory_space<vmem>>, vector<1x8xf32>
    tpu.vector_store %arg6[%c1, %c0_14], %17 {strides = array<i32>} : memref<8x8xf32, #tpu.memory_space<vmem>>, vector<1x8xf32>,
    return
  }
  func.func @transform_0(%arg0: i32) -> (i32, i32) {
    %c0_i32 = arith.constant 0 : i32
    %c0_i32_0 = arith.constant 0 : i32
    return %arg0, %c0_i32 : i32, i32
  }
  func.func @transform_1(%arg0: i32) -> (i32, i32) {
    %c0_i32 = arith.constant 0 : i32
    %c0_i32_0 = arith.constant 0 : i32
    %c0_i32_1 = arith.constant 0 : i32
    return %c0_i32, %c0_i32_0 : i32, i32
  }
  func.func @transform_2(%arg0: i32) -> (i32, i32) {
    %c0_i32 = arith.constant 0 : i32
    %c0_i32_0 = arith.constant 0 : i32
    %c0_i32_1 = arith.constant 0 : i32
    return %c0_i32, %c0_i32_0 : i32, i32
  }
  func.func @transform_3(%arg0: i32) -> (i32, i32) {
    %c0_i32 = arith.constant 0 : i32
    %c0_i32_0 = arith.constant 0 : i32
    %c0_i32_1 = arith.constant 0 : i32
    return %c0_i32, %c0_i32_0 : i32, i32
  }
  func.func @transform_4(%arg0: i32) -> (i32, i32) {
    %c0_i32 = arith.constant 0 : i32
    %c0_i32_0 = arith.constant 0 : i32
    return %arg0, %c0_i32 : i32, i32
  }
  func.func @transform_5(%arg0: i32) -> (i32, i32) {
    %c0_i32 = arith.constant 0 : i32
    %c0_i32_0 = arith.constant 0 : i32
    return %arg0, %c0_i32 : i32, i32
  }
}

</mosaic_0001>

<bundles_post_ra>
// kernel: decoder_forward.3
= control target key start
LH: loop header
LB: loop body
LE: loop exit
PB: predicated region body
PF: predicated region fallthrough
CT: control target
= control target key end

     0   :  { %9 = vsyncpa [#allocation3], 0  ;;  %s745_s0 = inlined_call_operand.hbm [shape: f32[128,16], index: 0, kind: input, shape index: {}]   ;;  %s746_s1 = inlined_call_operand.vmem [shape: f32[16,4], index: 1, kind: input, shape index: {}]   ;;  %s747_s2 = inlined_call_operand.vmem [shape: f32[128,4], index: 2, kind: output, shape index: {0}]   ;;  %s748_s3 = inlined_call_operand.vmem [shape: f32[32,4], index: 3, kind: output, shape index: {1}]  }
   0x1   :  { %11 = vsyncpa [#allocation3 + $0x1], 0  ;;  %s615_s12 = smov 0   ;;  %s617_s13 = smov 0  }
   0x2   :  { %s619_s14 = smov 0   ;;  %s621_s15 = smov 0  }
   0x3 LB: > { %s634_s16 = sadd.s32 4294967295, %s590_s15   ;;  %s637_s17 = sadd.s32 1, %s590_s15   ;;  %s590_s15 = sphi %s621_s15, %s755_s15   ;;  %s586_s14 = sphi %s619_s14, %s754_s14   ;;  %s582_s13 = sphi %s617_s13, %s753_s13   ;;  %s578_s12 = sphi %s615_s12, %s752_s12  }
   0x4   : > { %s21_s18 = ssub.s32 %s590_s15, %s637_s17  ;;  %s24_s19 = sadd.s32 1, %s586_s14 }
   0x5   : > { %p22_p0 = scmp.eq.s32.totalorder %s21_s18, 0  ;;  %p31_p1 = scmp.ne.s32.totalorder %s586_s14, %s582_s13 }
   0x6   : > { %p32_p2 = scmp.eq.s32.totalorder %s590_s15, 0  ;;  %p37_p3 = scmp.ne.s32.totalorder %s582_s13, %s578_s12 }
   0x7   : > { %s647_s20 = scalar_select %p22_p0, %s586_s14, %s24_s19  }
   0x8   : > { %p33_p4 = por %p32_p2, %p31_p1  ;;  %p38_p5 = scmp.eq.s32.totalorder %s634_s16, 0 }
   0x9   : > { %p491_p6 = scmp.lt.s32.totalorder %s590_s15, 4  ;;  %s137_s22 = sand.u32 1, %s586_s14  }
   0xa   : > { %p651_p7 = por %p38_p5, %p37_p3  ;;  %s448_s23 = sshll.u32 %s137_s22, 5 }
   0xb   : > { %s462_s24 = sshll.u32 %s590_s15, 9  ;;  %s141_s28 = scalar_lea.vmem [#allocation2], %s448_s23 }
   0xc   : > { %s660_s27 = scalar_lea.hbm %s745_s0, %s462_s24  ;;  %s148_s29 = sshll.u32 %s141_s28, 4  ;;  %s662_s29 = int_to_ptr.vmem [resolvable:$true] %s148_s29 }
   0xd   : > { %p664_p8 = pnand %p491_p6, %p33_p4  ;;  %s669_s4 = scalar_lea.sflag [#allocation3], %s137_s22 }
   0xe   : > { %s526_s5 = scalar_lea.hbm %s660_s27, 512  ;;  %s531_s8 = scalar_lea.hbm %s745_s0, 2048 }
   0xf   : > { %p527_p10 = scmp.ne.s32.totalorder %s660_s27, %s526_s5  ;;  %p528_p11 = pneg %p664_p8 }
  0x10   : > { %p532_p0 = scmp.lt.u32.totalorder %s660_s27, %s745_s0  ;;  %p533_p1 = scmp.lt.u32.totalorder %s531_s8, %s526_s5 }
  0x11   : > { %p529_p12 = pnand %p528_p11, %p527_p10  ;;  %p535_p3 = scmp.lt.u32.totalorder %s526_s5, %s660_s27 }
  0x12   : > { %p534_p2 = por %p533_p1, %p532_p0 }
  0x13   : > { %p530_p13 = pneg %p529_p12 }
  0x14   : > { %p536_p4 = por %p535_p3, %p534_p2 }
  0x16   : > { %p537_p5 = pnand %p536_p4, %p530_p13 }
  0x18   : > { %540 = shalt.err (!%p537_p5)
}
  0x19   : > { %s541_s11 = scalar_lea.vmem %s662_s29, 512  ;;  %s592_s12 = smov [#allocation2]  }
  0x1a   : > { %p542_p6 = scmp.ne.s32.totalorder %s662_s29, %s541_s11  ;;  %s546_s18 = sshll.u32 %s592_s12, 4  ;;  %s547_s18 = int_to_ptr.vmem [resolvable:$false] %s546_s18 }
  0x1b   : > { %s548_s19 = scalar_lea.vmem %s547_s18, 1024  ;;  %p549_p9 = scmp.lt.s32.totalorder %s662_s29, %s547_s18 }
  0x1c   : > { %p544_p10 = pnand %p542_p6, %p528_p11  ;;  %p550_p0 = scmp.lt.s32.totalorder %s548_s19, %s541_s11 }
  0x1e   : > { %p545_p12 = pneg %p544_p10  ;;  %p551_p1 = por %p550_p0, %p549_p9 }
  0x20   : > { %p552_p2 = pnand %p551_p1, %p545_p12 }
  0x22   : > { %555 = shalt.err (!%p552_p2)
}
  0x23   : > { %s593_s22 = smov 128   ;;  %s594_s23 = smov 8  }
  0x24   : > { %490 = dma.hbm_to_vmem [thread:$0]  (!%p664_p8), %s660_s27, 512, %s662_s29, %s669_s4, %s593_s22, %s593_s22, %s594_s23  }
  0x25   : > { %p156_p11 = scmp.lt.s32.totalorder %s590_s15, 5  ;;  %p751_p13 = scmp.ge.s32.totalorder %s590_s15, 1 }
  0x27   : > { %p157_p3 = pnand %p751_p13, %p156_p11 }
  0x28   : > { %s162_s24 = sand.u32 (!%p157_p3), 1, %s582_s13  }
  0x29   : > { %160 = sbr.rel (%p157_p3) target bundleno = 291 (0x123), region = 28  ;;  %s452_s25 = sshll.u32 (!%p157_p3), %s162_s24, 5 }
  0x2a   : > { %s163_s26 = scalar_lea.sflag (!%p157_p3), [#allocation3], %s162_s24  ;;  %s166_s28 = scalar_lea.vmem (!%p157_p3), [#allocation2], %s452_s25 }
  0x30   : > { %573 = dma.done.wait (%p651_p7), %s163_s26, 512  }
  0x31   : > { %575 = vsyncadd (%p651_p7), %s163_s26, 4294966784  ;;  %vm210_vm0 = vcmask 130048   ;;  %v208_v0 = vld [vmem:[%s746_s1] sm:$0xff]  ;;  %v209_v1 = vld [vmem:[%s746_s1 + $0x8] sm:$0xff]  ;;  %s453_s21 = sshll.u32 %s634_s16, 2  ;;  %vm308_vm1 = vcmask 31744  }
  0x32   : > { %v204_v2 = vld [vmem:[%s166_s28] sm:$0xff]  ;;  %v479_v3 = vpack.c.bf16 %v209_v1, %v208_v0  ;;  %v206_v4 = vld [vmem:[%s166_s28 + $0x10] sm:$0xff]  ;;  %v205_v5 = vld [vmem:[%s166_s28 + $0x8] sm:$0xff]  ;;  %p195_p7 = scmp.lt.s32.totalorder %s453_s21, 15  ;;  %p200_p8 = scmp.lt.s32.totalorder %s634_s16, 3  ;;  %vm326_vm2 = vcmask 24576  }
  0x33   : > { %473 = vmatprep.mubr.msk.f32.mxu0 %vm210_vm0, %v204_v2  ;;  %476 = vmatprep.mubr.msk.f32.mxu1 %vm210_vm0, %v206_v4  ;;  %v207_v6 = vld [vmem:[%s166_s28 + $0x18] sm:$0xff] }
  0x34   : > { %480 = vmatprep.subr.bf16.mxu0 %v479_v3  ;;  %483 = vmatprep.subr.bf16.mxu1 %v479_v3  ;;  %s757_s21 = smov (!%p195_p7, %s453_s21), 15  ;;  %s759_s16 = smov (!%p200_p8, %s634_s16), 3 }
  0x35   : > { %482 = vmatpush3.bf16.msra.mxu0 %v479_v3  ;;  %484 = vmatpush3.bf16.msra.mxu1 %v479_v3  ;;  %s454_s29 = sshll.u32 %s757_s21, 3  ;;  %s455_s8 = sshll.u32 %s759_s16, 3 }
  0x36   : > { %s198_s7 = scalar_lea.vmem %s747_s2, %s454_s29  ;;  %s203_s11 = scalar_lea.vmem %s748_s3, %s455_s8 }
  0x38   : > { %474 = vmatmul.mubr.msk.f32.vlgmr.msra.gmra.mrb[0].mxu0 %vm210_vm0, %v205_v5  ;;  %477 = vmatmul.mubr.msk.f32.vlgmr.msra.gmra.mrb[0].mxu1 %vm210_vm0, %v207_v6 }
 0x10b   : > { %v475_v7 = vpop.f32.mrb[0].mxu0  ;;  %v478_v8 = vpop.f32.mrb[0].mxu1 }
 0x10c   : > { %310 = vst.msk [vmem:[%s198_s7 + $0x8] sm:$0xff] %vm308_vm1, %v475_v7  ;;  %v314_v9 = vsel %vm308_vm1, %v475_v7, 0.0  ;;  %v329_v10 = vmul.f32 %v475_v7, %v475_v7  ;;  %v289_v11 = vpop.f32.mrb[1].mxu0  ;;  %312 = vst.msk [vmem:[%s198_s7 + $0x18] sm:$0xff] %vm308_vm1, %v478_v8  ;;  %v299_v12 = vpop.f32.mrb[1].mxu1  ;;  %v331_v20 = vmul.f32 %v478_v8, %v478_v8  ;;  %v318_v24 = vsel %vm308_vm1, %v478_v8, 0.0 }
 0x10d   : > { %309 = vst.msk [vmem:[%s198_s7] sm:$0xff] %vm308_vm1, %v289_v11  ;;  %v313_v13 = vsel %vm308_vm1, %v289_v11, 0.0  ;;  %v328_v14 = vmul.f32 %v289_v11, %v289_v11  ;;  %311 = vst.msk [vmem:[%s198_s7 + $0x10] sm:$0xff] %vm308_vm1, %v299_v12  ;;  %v316_v15 = vsel %vm308_vm1, %v299_v12, 0.0  ;;  %v330_v16 = vmul.f32 %v299_v12, %v299_v12 }
 0x10e   : > { %v333_v17 = vsel %vm308_vm1, %v329_v10, 0.0  ;;  %v315_v18 = vadd.f32 %v314_v9, %v313_v13  ;;  %v337_v27 = vsel %vm308_vm1, %v331_v20, 0.0 }
 0x10f   : > { %v332_v19 = vsel %vm308_vm1, %v328_v14, 0.0  ;;  %v335_v21 = vsel %vm308_vm1, %v330_v16, 0.0 }
 0x110   : > { %v334_v22 = vadd.f32 %v333_v17, %v332_v19  ;;  %v317_v23 = vadd.f32 %v316_v15, %v315_v18 }
 0x112   : > { %v319_v25 = vadd.f32 %v318_v24, %v317_v23  ;;  %v336_v26 = vadd.f32 %v335_v21, %v334_v22 }
 0x114   : > { %v320_v28 = vrot.slane %v319_v25, 4  ;;  %v338_v29 = vadd.f32 %v337_v27, %v336_v26 }
 0x116   : > { %v321_v30 = vadd.f32 %v320_v28, %v319_v25  ;;  %v339_v31 = vrot.slane %v338_v29, 4 }
 0x118   : > { %v322_v32 = vrot.slane %v321_v30, 2  ;;  %v340_v33 = vadd.f32 %v339_v31, %v338_v29 }
 0x11a   : > { %v323_v34 = vadd.f32 %v322_v32, %v321_v30  ;;  %v341_v35 = vrot.slane %v340_v33, 2 }
 0x11c   : > { %v324_v36 = vrot.slane %v323_v34, 1  ;;  %v342_v37 = vadd.f32 %v341_v35, %v340_v33 }
 0x11e   : > { %v325_v38 = vadd.f32 %v324_v36, %v323_v34  ;;  %v343_v39 = vrot.slane %v342_v37, 1 }
 0x120   : > { %327 = vst.msk [vmem:[%s203_s11] sm:$0x1] %vm326_vm2, %v325_v38  ;;  %v344_v40 = vadd.f32 %v343_v39, %v342_v37 }
 0x122   : > { %345 = vst.msk [vmem:[%s203_s11 + $0x1] sm:$0x1] %vm326_vm2, %v344_v40 }
 0x123 PF: > { %p14_p9 = scmp.ge.s32.totalorder %s637_s17, 6   ;;  %s752_s12 = smov %s582_s13 }
 0x124   : > { %s753_s13 = smov %s586_s14  ;;  %s754_s14 = smov %s647_s20 }
 0x125   : > { %s755_s15 = smov %s637_s17  ;;  %16 = sbr.rel (!%p14_p9) target bundleno = 3 (0x3), region = 80 }
 0x12c   :  { %382 = vsyncpa [#allocation3], 1 }
 0x12d   :  { %384 = vsyncpa [#allocation3 + $0x1], 1 }

// kernel: decoder_forward.4
= control target key start
LH: loop header
LB: loop body
LE: loop exit
PB: predicated region body
PF: predicated region fallthrough
CT: control target
= control target key end

     0   :  { %s735_s12 = smov 0   ;;  %s898_s0 = inlined_call_operand.vmem [shape: f32[512,36], index: 0, kind: input, shape index: {}]   ;;  %s899_s1 = inlined_call_operand.vmem [shape: f32[36,4], index: 1, kind: input, shape index: {}]   ;;  %s900_s2 = inlined_call_operand.vmem [shape: f32[512,4], index: 2, kind: output, shape index: {0}]   ;;  %s901_s3 = inlined_call_operand.vmem [shape: f32[32,4], index: 3, kind: output, shape index: {1}]  }
   0x1 LB: > { %s741_s13 = sadd.s32 4294967295, %s713_s12   ;;  %p605_p0 = scmp.ge.s32.totalorder %s713_s12, 1  ;;  %s713_s12 = sphi %s735_s12, %s14_s12  }
   0x2   : > { %p141_p1 = scmp.lt.s32.totalorder %s713_s12, 5 }
   0x4   : > { %p142_p2 = pnand %p605_p0, %p141_p1 }
   0x5   : > { %v201_v0 = vld [vmem:[%s899_s1] sm:$0xff] (!%p142_p2)  ;;  %v202_v1 = vld [vmem:[%s899_s1 + $0x8] sm:$0xff] (!%p142_p2)  ;;  %v203_v2 = vld [vmem:[%s899_s1 + $0x10] sm:$0xff] (!%p142_p2)  ;;  %s606_s20 = sshll.u32 (!%p142_p2), %s741_s13, 4  ;;  %vm206_vm0 = vcmask (!%p142_p2), 293888   ;;  %vm255_vm1 = vcmask (!%p142_p2), 1043456  }
   0x6   : > { %145 = sbr.rel (%p142_p2) target bundleno = 279 (0x117), region = 28  ;;  %v685_v3 = vpack.c.bf16 (!%p142_p2), %v202_v1, %v201_v0  ;;  %v204_v4 = vld [vmem:[%s899_s1 + $0x18] sm:$0xff] (!%p142_p2)  ;;  %p170_p3 = scmp.lt.s32.totalorder (!%p142_p2), %s606_s20, 63  ;;  %v205_v6 = vld [vmem:[%s899_s1 + $0x20] sm:$0xf] (!%p142_p2)  ;;  %vm404_vm2 = vcmask (!%p142_p2), 31744  }
   0x7   : > { %v689_v5 = vpack.c.bf16 (!%p142_p2), %v204_v4, %v203_v2  ;;  %p181_p4 = scmp.lt.s32.totalorder (!%p142_p2), %s741_s13, 3  ;;  %vm458_vm3 = vcmask (!%p142_p2), 24576  }
   0x8   : > { %686 = vmatprep.subr.bf16.mxu0 (!%p142_p2), %v685_v3  ;;  %693 = vmatprep.subr.bf16.mxu1 (!%p142_p2), %v685_v3 }
   0x9   : > { %688 = vmatpush3.bf16.msra.mxu0 (!%p142_p2), %v685_v3  ;;  %696 = vmatpush3.bf16.msra.mxu1 (!%p142_p2), %v685_v3 }
   0xa   : > { %690 = vmatprep.subr.bf16.mxu0 (!%p142_p2), %v689_v5  ;;  %694 = vmatprep.subr.bf16.mxu1 (!%p142_p2), %v689_v5 }
   0xd   : > { %s903_s20 = smov (!%p170_p3, %s606_s20), 63  ;;  %692 = vmatpush3.bf16.msra.mxu0 %v689_v5  ;;  %697 = vmatpush3.bf16.msra.mxu1 %v689_v5  ;;  %s905_s13 = smov (!%p181_p4, %s741_s13), 3 }
   0xe   : > { %s607_s23 = sshll.u32 %s903_s20, 3  ;;  %659 = vmatprep.subr.msk.mxu0 %vm255_vm1, %v205_v6  ;;  %695 = vmatprep.subr.msk.mxu1 %vm255_vm1, %v205_v6  ;;  %s610_s5 = sshll.u32 %s905_s13, 3 }
   0xf   : > { %s769_s28 = scalar_lea.vmem %s898_s0, %s607_s23  ;;  %s812_s4 = scalar_lea.vmem %s900_s2, %s607_s23 }
  0x10   : > { %v185_v7 = vld [vmem:[%s769_s28] sm:$0xff]  ;;  %v186_v9 = vld [vmem:[%s769_s28 + $0x8] sm:$0xff]  ;;  %v187_v10 = vld [vmem:[%s769_s28 + $0x10] sm:$0xff]  ;;  %s184_s8 = scalar_lea.vmem %s901_s3, %s610_s5 }
  0x11   : > { %661 = vmatprep.mubr.msk.f32.mxu0 %vm206_vm0, %v185_v7  ;;  %v193_v8 = vld [vmem:[%s769_s28 + $0x40] sm:$0xff]  ;;  %v194_v11 = vld [vmem:[%s769_s28 + $0x48] sm:$0xff]  ;;  %660 = vmatpush3.msk.msra.mxu0 %vm255_vm1, %v205_v6  ;;  %v195_v12 = vld [vmem:[%s769_s28 + $0x50] sm:$0xff] }
  0x12   : > { %673 = vmatprep.mubr.msk.f32.mxu1 %vm206_vm0, %v193_v8  ;;  %662 = vmatmul.mubr.msk.f32.vlgmr.msra.gmra.mrb[0].mxu0 %vm206_vm0, %v186_v9  ;;  %v188_v13 = vld [vmem:[%s769_s28 + $0x18] sm:$0xff]  ;;  %v189_v14 = vld [vmem:[%s769_s28 + $0x20] sm:$0xff]  ;;  %v190_v17 = vld [vmem:[%s769_s28 + $0x28] sm:$0xff] }
  0x13   : > { %698 = vmatpush3.msk.msra.mxu1 %vm255_vm1, %v205_v6  ;;  %664 = vmatprep.mubr.msk.f32.mxu0 %vm206_vm0, %v187_v10  ;;  %v196_v15 = vld [vmem:[%s769_s28 + $0x58] sm:$0xff]  ;;  %v197_v16 = vld [vmem:[%s769_s28 + $0x60] sm:$0xff]  ;;  %v191_v18 = vld [vmem:[%s769_s28 + $0x30] sm:$0xff] }
  0x14   : > { %674 = vmatmul.mubr.msk.f32.vlgmr.msra.gmra.mrb[0].mxu1 %vm206_vm0, %v194_v11  ;;  %v198_v19 = vld [vmem:[%s769_s28 + $0x68] sm:$0xff]  ;;  %v199_v20 = vld [vmem:[%s769_s28 + $0x70] sm:$0xff]  ;;  %v192_v21 = vld [vmem:[%s769_s28 + $0x38] sm:$0xff] }
  0x15   : > { %676 = vmatprep.mubr.msk.f32.mxu1 %vm206_vm0, %v195_v12  ;;  %v200_v22 = vld [vmem:[%s769_s28 + $0x78] sm:$0xff] }
  0x16   : > { %665 = vmatmul.mubr.msk.f32.gmra.mrb[2].mxu0 %vm206_vm0, %v188_v13 }
  0x17   : > { %667 = vmatprep.mubr.msk.f32.mxu0 %vm206_vm0, %v189_v14 }
  0x18   : > { %677 = vmatmul.mubr.msk.f32.gmra.mrb[2].mxu1 %vm206_vm0, %v196_v15 }
  0x19   : > { %679 = vmatprep.mubr.msk.f32.mxu1 %vm206_vm0, %v197_v16 }
  0x1a   : > { %668 = vmatmul.mubr.msk.f32.gmra.mrb[4].mxu0 %vm206_vm0, %v190_v17 }
  0x1b   : > { %670 = vmatprep.mubr.msk.f32.mxu0 %vm206_vm0, %v191_v18 }
  0x1c   : > { %680 = vmatmul.mubr.msk.f32.gmra.mrb[4].mxu1 %vm206_vm0, %v198_v19 }
  0x1d   : > { %682 = vmatprep.mubr.msk.f32.mxu1 %vm206_vm0, %v199_v20 }
  0x1e   : > { %671 = vmatmul.mubr.msk.f32.gmra.mrb[6].mxu0 %vm206_vm0, %v192_v21 }
  0x20   : > { %683 = vmatmul.mubr.msk.f32.gmra.mrb[6].mxu1 %vm206_vm0, %v200_v22 }
  0xe5   : > { %v663_v23 = vpop.f32.mrb[0].mxu0 }
  0xe6   : > { %406 = vst.msk [vmem:[%s812_s4 + $0x8] sm:$0xff] %vm404_vm2, %v663_v23  ;;  %v422_v24 = vsel %vm404_vm2, %v663_v23, 0.0  ;;  %v461_v25 = vmul.f32 %v663_v23, %v663_v23  ;;  %v325_v26 = vpop.f32.mrb[1].mxu0 }
  0xe7   : > { %v817_v27 = vpop.f32.mrb[0].mxu1  ;;  %405 = vst.msk [vmem:[%s812_s4] sm:$0xff] %vm404_vm2, %v325_v26  ;;  %v421_v28 = vsel %vm404_vm2, %v325_v26, 0.0  ;;  %v460_v29 = vmul.f32 %v325_v26, %v325_v26 }
  0xe8   : > { %414 = vst.msk [vmem:[%s812_s4 + $0x48] sm:$0xff] %vm404_vm2, %v817_v27  ;;  %v365_v30 = vpop.f32.mrb[1].mxu1  ;;  %v477_v31 = vsel %vm404_vm2, %v461_v25, 0.0  ;;  %v423_v32 = vadd.f32 %v422_v24, %v421_v28  ;;  %v469_v14 = vmul.f32 %v817_v27, %v817_v27  ;;  %v438_v19 = vsel %vm404_vm2, %v817_v27, 0.0 }
  0xe9   : > { %413 = vst.msk [vmem:[%s812_s4 + $0x40] sm:$0xff] %vm404_vm2, %v365_v30  ;;  %v476_v33 = vsel %vm404_vm2, %v460_v29, 0.0  ;;  %v666_v34 = vpop.f32.mrb[2].mxu0  ;;  %v468_v63 = vmul.f32 %v365_v30, %v365_v30  ;;  %v436_v10 = vsel %vm404_vm2, %v365_v30, 0.0 }
  0xea   : > { %v478_v35 = vadd.f32 %v477_v31, %v476_v33  ;;  %408 = vst.msk [vmem:[%s812_s4 + $0x18] sm:$0xff] %vm404_vm2, %v666_v34  ;;  %v335_v36 = vpop.f32.mrb[3].mxu0  ;;  %v463_v38 = vmul.f32 %v666_v34, %v666_v34  ;;  %v426_v43 = vsel %vm404_vm2, %v666_v34, 0.0  ;;  %v493_v23 = vsel %vm404_vm2, %v469_v14, 0.0 }
  0xeb   : > { %v831_v37 = vpop.f32.mrb[2].mxu1  ;;  %407 = vst.msk [vmem:[%s812_s4 + $0x10] sm:$0xff] %vm404_vm2, %v335_v36  ;;  %v424_v39 = vsel %vm404_vm2, %v335_v36, 0.0  ;;  %v462_v40 = vmul.f32 %v335_v36, %v335_v36  ;;  %v491_v15 = vsel %vm404_vm2, %v468_v63, 0.0 }
  0xec   : > { %416 = vst.msk [vmem:[%s812_s4 + $0x58] sm:$0xff] %vm404_vm2, %v831_v37  ;;  %v375_v41 = vpop.f32.mrb[3].mxu1  ;;  %v425_v42 = vadd.f32 %v424_v39, %v423_v32  ;;  %v481_v50 = vsel %vm404_vm2, %v463_v38, 0.0  ;;  %v471_v24 = vmul.f32 %v831_v37, %v831_v37  ;;  %v442_v30 = vsel %vm404_vm2, %v831_v37, 0.0 }
  0xed   : > { %415 = vst.msk [vmem:[%s812_s4 + $0x50] sm:$0xff] %vm404_vm2, %v375_v41  ;;  %v479_v44 = vsel %vm404_vm2, %v462_v40, 0.0  ;;  %v669_v45 = vpop.f32.mrb[4].mxu0  ;;  %v470_v16 = vmul.f32 %v375_v41, %v375_v41  ;;  %v440_v20 = vsel %vm404_vm2, %v375_v41, 0.0 }
  0xee   : > { %v480_v46 = vadd.f32 %v479_v44, %v478_v35  ;;  %410 = vst.msk [vmem:[%s812_s4 + $0x28] sm:$0xff] %vm404_vm2, %v669_v45  ;;  %v345_v47 = vpop.f32.mrb[5].mxu0  ;;  %v427_v48 = vadd.f32 %v426_v43, %v425_v42  ;;  %v465_v51 = vmul.f32 %v669_v45, %v669_v45  ;;  %v430_v57 = vsel %vm404_vm2, %v669_v45, 0.0 }
  0xef   : > { %v681_v49 = vpop.f32.mrb[4].mxu1  ;;  %409 = vst.msk [vmem:[%s812_s4 + $0x20] sm:$0xff] %vm404_vm2, %v345_v47  ;;  %v428_v52 = vsel %vm404_vm2, %v345_v47, 0.0  ;;  %v464_v53 = vmul.f32 %v345_v47, %v345_v47  ;;  %v495_v25 = vsel %vm404_vm2, %v470_v16, 0.0  ;;  %v497_v33 = vsel %vm404_vm2, %v471_v24, 0.0 }
  0xf0   : > { %418 = vst.msk [vmem:[%s812_s4 + $0x68] sm:$0xff] %vm404_vm2, %v681_v49  ;;  %v385_v54 = vpop.f32.mrb[5].mxu1  ;;  %v429_v55 = vadd.f32 %v428_v52, %v427_v48  ;;  %v482_v56 = vadd.f32 %v481_v50, %v480_v46  ;;  %v485_v1 = vsel %vm404_vm2, %v465_v51, 0.0  ;;  %v473_v34 = vmul.f32 %v681_v49, %v681_v49 }
  0xf1   : > { %417 = vst.msk [vmem:[%s812_s4 + $0x60] sm:$0xff] %vm404_vm2, %v385_v54  ;;  %v483_v58 = vsel %vm404_vm2, %v464_v53, 0.0  ;;  %v672_v59 = vpop.f32.mrb[6].mxu0  ;;  %v472_v26 = vmul.f32 %v385_v54, %v385_v54  ;;  %v444_v31 = vsel %vm404_vm2, %v385_v54, 0.0  ;;  %v446_v40 = vsel %vm404_vm2, %v681_v49, 0.0 }
  0xf2   : > { %v484_v60 = vadd.f32 %v483_v58, %v482_v56  ;;  %412 = vst.msk [vmem:[%s812_s4 + $0x38] sm:$0xff] %vm404_vm2, %v672_v59  ;;  %v355_v61 = vpop.f32.mrb[7].mxu0  ;;  %v431_v62 = vadd.f32 %v430_v57, %v429_v55  ;;  %v467_v2 = vmul.f32 %v672_v59, %v672_v59  ;;  %v434_v8 = vsel %vm404_vm2, %v672_v59, 0.0 }
  0xf3   : > { %v684_v0 = vpop.f32.mrb[6].mxu1  ;;  %411 = vst.msk [vmem:[%s812_s4 + $0x30] sm:$0xff] %vm404_vm2, %v355_v61  ;;  %v432_v3 = vsel %vm404_vm2, %v355_v61, 0.0  ;;  %v466_v4 = vmul.f32 %v355_v61, %v355_v61  ;;  %v499_v35 = vsel %vm404_vm2, %v472_v26, 0.0  ;;  %v501_v43 = vsel %vm404_vm2, %v473_v34, 0.0 }
  0xf4   : > { %420 = vst.msk [vmem:[%s812_s4 + $0x78] sm:$0xff] %vm404_vm2, %v684_v0  ;;  %v395_v5 = vpop.f32.mrb[7].mxu1  ;;  %v433_v6 = vadd.f32 %v432_v3, %v431_v62  ;;  %v486_v7 = vadd.f32 %v485_v1, %v484_v60  ;;  %v489_v13 = vsel %vm404_vm2, %v467_v2, 0.0  ;;  %v475_v44 = vmul.f32 %v684_v0, %v684_v0 }
  0xf5   : > { %419 = vst.msk [vmem:[%s812_s4 + $0x70] sm:$0xff] %vm404_vm2, %v395_v5  ;;  %v487_v9 = vsel %vm404_vm2, %v466_v4, 0.0  ;;  %v474_v36 = vmul.f32 %v395_v5, %v395_v5  ;;  %v448_v41 = vsel %vm404_vm2, %v395_v5, 0.0  ;;  %v450_v48 = vsel %vm404_vm2, %v684_v0, 0.0 }
  0xf6   : > { %v435_v11 = vadd.f32 %v434_v8, %v433_v6  ;;  %v488_v12 = vadd.f32 %v487_v9, %v486_v7  ;;  %v505_v52 = vsel %vm404_vm2, %v475_v44, 0.0 }
  0xf7   : > { %v503_v45 = vsel %vm404_vm2, %v474_v36, 0.0 }
  0xf8   : > { %v490_v17 = vadd.f32 %v489_v13, %v488_v12  ;;  %v437_v18 = vadd.f32 %v436_v10, %v435_v11 }
  0xfa   : > { %v492_v21 = vadd.f32 %v491_v15, %v490_v17  ;;  %v439_v22 = vadd.f32 %v438_v19, %v437_v18 }
  0xfc   : > { %v441_v28 = vadd.f32 %v440_v20, %v439_v22  ;;  %v494_v29 = vadd.f32 %v493_v23, %v492_v21 }
  0xfe   : > { %v496_v27 = vadd.f32 %v495_v25, %v494_v29  ;;  %v443_v32 = vadd.f32 %v442_v30, %v441_v28 }
 0x100   : > { %v445_v38 = vadd.f32 %v444_v31, %v443_v32  ;;  %v498_v39 = vadd.f32 %v497_v33, %v496_v27 }
 0x102   : > { %v500_v42 = vadd.f32 %v499_v35, %v498_v39  ;;  %v447_v37 = vadd.f32 %v446_v40, %v445_v38 }
 0x104   : > { %v449_v46 = vadd.f32 %v448_v41, %v447_v37  ;;  %v502_v47 = vadd.f32 %v501_v43, %v500_v42 }
 0x106   : > { %v451_v50 = vadd.f32 %v450_v48, %v449_v46  ;;  %v504_v51 = vadd.f32 %v503_v45, %v502_v47 }
 0x108   : > { %v452_v49 = vrot.slane %v451_v50, 4  ;;  %v506_v53 = vadd.f32 %v505_v52, %v504_v51 }
 0x10a   : > { %v453_v54 = vadd.f32 %v452_v49, %v451_v50  ;;  %v507_v55 = vrot.slane %v506_v53, 4 }
 0x10c   : > { %v454_v56 = vrot.slane %v453_v54, 2  ;;  %v508_v57 = vadd.f32 %v507_v55, %v506_v53 }
 0x10e   : > { %v455_v58 = vadd.f32 %v454_v56, %v453_v54  ;;  %v509_v59 = vrot.slane %v508_v57, 2 }
 0x110   : > { %v456_v60 = vrot.slane %v455_v58, 1  ;;  %v510_v61 = vadd.f32 %v509_v59, %v508_v57 }
 0x112   : > { %v457_v62 = vadd.f32 %v456_v60, %v455_v58  ;;  %v511_v63 = vrot.slane %v510_v61, 1 }
 0x114   : > { %459 = vst.msk [vmem:[%s184_s8] sm:$0x1] %vm458_vm3, %v457_v62  ;;  %v512_v0 = vadd.f32 %v511_v63, %v510_v61 }
 0x116   : > { %513 = vst.msk [vmem:[%s184_s8 + $0x1] sm:$0x1] %vm458_vm3, %v512_v0 }
 0x117 PF: > { %s14_s12 = sadd.s32 1, %s713_s12  }
 0x118   : > { %p11_p5 = scmp.ge.s32.totalorder %s14_s12, 6  }
 0x11a   :  { %13 = sbr.rel (!%p11_p5) target bundleno = 1 (0x1), region = 70 }

// kernel: decoder_forward.5
= control target key start
LH: loop header
LB: loop body
LE: loop exit
PB: predicated region body
PF: predicated region fallthrough
CT: control target
= control target key end

     0   :  { %s835_s18 = smov 0   ;;  %s1012_s0 = inlined_call_operand.vmem [shape: f32[512,4], index: 0, kind: input, shape index: {}]   ;;  %s1013_s1 = inlined_call_operand.vmem [shape: f32[1,4], index: 1, kind: input, shape index: {}]   ;;  %s1014_s2 = inlined_call_operand.vmem [shape: f32[1,4], index: 2, kind: input, shape index: {}]   ;;  %s1015_s3 = inlined_call_operand.vmem [shape: f32[4,8], index: 3, kind: input, shape index: {}]   ;;  %s1016_s4 = inlined_call_operand.vmem [shape: f32[512,8], index: 4, kind: output, shape index: {0}]   ;;  %s1017_s5 = inlined_call_operand.vmem [shape: f32[32,8], index: 5, kind: output, shape index: {1}]  }
   0x1 LB: > { %s841_s19 = sadd.s32 4294967295, %s803_s18   ;;  %p717_p0 = scmp.ge.s32.totalorder %s803_s18, 1  ;;  %s803_s18 = sphi %s835_s18, %s16_s18  }
   0x2   : > { %p191_p1 = scmp.lt.s32.totalorder %s803_s18, 5 }
   0x4   : > { %p192_p2 = pnand %p717_p0, %p191_p1 }
   0x5   : > { %v317_v0 = vld [vmem:[%s1015_s3] sm:$0xf] (!%p192_p2)  ;;  %vm367_vm0 = vcmask (!%p192_p2), 1043456   ;;  %s718_s22 = sshll.u32 (!%p192_p2), %s841_s19, 4  ;;  %vm318_vm1 = vcmask (!%p192_p2), 31744   ;;  %vm516_vm2 = vcmask (!%p192_p2), 64512  }
   0x6   : > { %195 = sbr.rel (%p192_p2) target bundleno = 285 (0x11d), region = 36  ;;  %761 = vmatprep.subr.msk.mxu0 (!%p192_p2), %vm367_vm0, %v317_v0  ;;  %p224_p3 = scmp.lt.s32.totalorder (!%p192_p2), %s718_s22, 63  ;;  %787 = vmatprep.subr.msk.mxu1 (!%p192_p2), %vm367_vm0, %v317_v0  ;;  %v855_v1 = vld [vmem:[%s1013_s1] ss:$0 sm:$0xff] (!%p192_p2)  ;;  %vm570_vm3 = vcmask (!%p192_p2), 57344  }
   0x7   : > { %762 = vmatpush3.msk.msra.mxu0 (!%p192_p2), %vm367_vm0, %v317_v0  ;;  %788 = vmatpush3.msk.msra.mxu1 (!%p192_p2), %vm367_vm0, %v317_v0  ;;  %v867_v2 = vld [vmem:[%s1014_s2] ss:$0 sm:$0xff] (!%p192_p2)  ;;  %p235_p4 = scmp.lt.s32.totalorder (!%p192_p2), %s841_s19, 3 }
   0xd   : > { %s1019_s22 = smov (!%p224_p3, %s718_s22), 63  ;;  %s1021_s19 = smov (!%p235_p4, %s841_s19), 3 }
   0xe   : > { %s719_s23 = sshll.u32 %s1019_s22, 3  ;;  %s722_s9 = sshll.u32 %s1021_s19, 3 }
   0xf   : > { %s862_s28 = scalar_lea.vmem %s1012_s0, %s719_s23  ;;  %s938_s8 = scalar_lea.vmem %s1016_s4, %s719_s23 }
  0x10   : > { %v239_v3 = vld [vmem:[%s862_s28] sm:$0xff]  ;;  %v240_v4 = vld [vmem:[%s862_s28 + $0x8] sm:$0xff]  ;;  %v241_v5 = vld [vmem:[%s862_s28 + $0x10] sm:$0xff]  ;;  %s238_s12 = scalar_lea.vmem %s1017_s5, %s722_s9 }
  0x11   : > { %v262_v6 = vmul.f32 %v855_v1, %v239_v3  ;;  %v263_v7 = vmul.f32 %v855_v1, %v240_v4  ;;  %v264_v8 = vmul.f32 %v855_v1, %v241_v5  ;;  %v242_v9 = vld [vmem:[%s862_s28 + $0x18] sm:$0xff]  ;;  %v243_v10 = vld [vmem:[%s862_s28 + $0x20] sm:$0xff]  ;;  %v244_v11 = vld [vmem:[%s862_s28 + $0x28] sm:$0xff] }
  0x12   : > { %v265_v12 = vmul.f32 %v855_v1, %v242_v9  ;;  %v266_v13 = vmul.f32 %v855_v1, %v243_v10  ;;  %v267_v14 = vmul.f32 %v855_v1, %v244_v11  ;;  %v245_v15 = vld [vmem:[%s862_s28 + $0x30] sm:$0xff]  ;;  %v246_v19 = vld [vmem:[%s862_s28 + $0x38] sm:$0xff]  ;;  %v247_v22 = vld [vmem:[%s862_s28 + $0x40] sm:$0xff] }
  0x13   : > { %v285_v16 = vadd.f32 %v867_v2, %v262_v6  ;;  %v286_v17 = vadd.f32 %v867_v2, %v263_v7  ;;  %v287_v18 = vadd.f32 %v867_v2, %v264_v8  ;;  %v268_v21 = vmul.f32 %v855_v1, %v245_v15  ;;  %v248_v23 = vld [vmem:[%s862_s28 + $0x48] sm:$0xff]  ;;  %v249_v24 = vld [vmem:[%s862_s28 + $0x50] sm:$0xff]  ;;  %v250_v29 = vld [vmem:[%s862_s28 + $0x58] sm:$0xff] }
  0x14   : > { %v288_v20 = vadd.f32 %v867_v2, %v265_v12  ;;  %v289_v28 = vadd.f32 %v867_v2, %v266_v13  ;;  %v251_v30 = vld [vmem:[%s862_s28 + $0x60] sm:$0xff]  ;;  %v290_v31 = vadd.f32 %v867_v2, %v267_v14  ;;  %v269_v32 = vmul.f32 %v855_v1, %v246_v19  ;;  %v252_v36 = vld [vmem:[%s862_s28 + $0x68] sm:$0xff]  ;;  %v253_v37 = vld [vmem:[%s862_s28 + $0x70] sm:$0xff] }
  0x15   : > { %v301_v25 = vmax.f32 %v285_v16, 0.0  ;;  %v302_v26 = vmax.f32 %v286_v17, 0.0  ;;  %v303_v27 = vmax.f32 %v287_v18, 0.0  ;;  %v270_v33 = vmul.f32 %v855_v1, %v247_v22  ;;  %v254_v53 = vld [vmem:[%s862_s28 + $0x78] sm:$0xff] }
  0x16   : > { %v271_v34 = vmul.f32 %v855_v1, %v248_v23  ;;  %v272_v35 = vmul.f32 %v855_v1, %v249_v24  ;;  %v304_v38 = vmax.f32 %v288_v20, 0.0  ;;  %v291_v39 = vadd.f32 %v867_v2, %v268_v21 }
  0x17   : > { %763 = vmatprep.mubr.msk.f32.mxu0 %vm318_vm1, %v301_v25  ;;  %v273_v40 = vmul.f32 %v855_v1, %v250_v29  ;;  %v274_v41 = vmul.f32 %v855_v1, %v251_v30  ;;  %v305_v42 = vmax.f32 %v289_v28, 0.0  ;;  %v293_v43 = vadd.f32 %v867_v2, %v270_v33 }
  0x18   : > { %764 = vmatmul.mubr.msk.f32.vlgmr.msra.gmra.mrb[0].mxu0 %vm318_vm1, %v302_v26  ;;  %v294_v44 = vadd.f32 %v867_v2, %v271_v34  ;;  %v295_v45 = vadd.f32 %v867_v2, %v272_v35  ;;  %v275_v47 = vmul.f32 %v855_v1, %v252_v36  ;;  %v276_v48 = vmul.f32 %v855_v1, %v253_v37 }
  0x19   : > { %766 = vmatprep.mubr.msk.f32.mxu0 %vm318_vm1, %v303_v27  ;;  %v296_v46 = vadd.f32 %v867_v2, %v273_v40  ;;  %v309_v49 = vmax.f32 %v293_v43, 0.0  ;;  %v297_v52 = vadd.f32 %v867_v2, %v274_v41  ;;  %v306_v54 = vmax.f32 %v290_v31, 0.0 }
  0x1a   : > { %v310_v50 = vmax.f32 %v294_v44, 0.0  ;;  %v311_v51 = vmax.f32 %v295_v45, 0.0  ;;  %v292_v55 = vadd.f32 %v867_v2, %v269_v32  ;;  %v307_v56 = vmax.f32 %v291_v39, 0.0 }
  0x1b   : > { %775 = vmatprep.mubr.msk.f32.mxu1 %vm318_vm1, %v309_v49  ;;  %v312_v57 = vmax.f32 %v296_v46, 0.0  ;;  %v298_v58 = vadd.f32 %v867_v2, %v275_v47  ;;  %v277_v59 = vmul.f32 %v855_v1, %v254_v53  ;;  %v313_v60 = vmax.f32 %v297_v52, 0.0 }
  0x1c   : > { %767 = vmatmul.mubr.msk.f32.gmra.mrb[2].mxu0 %vm318_vm1, %v304_v38  ;;  %776 = vmatmul.mubr.msk.f32.vlgmr.msra.gmra.mrb[0].mxu1 %vm318_vm1, %v310_v50  ;;  %v299_v61 = vadd.f32 %v867_v2, %v276_v48  ;;  %v308_v62 = vmax.f32 %v292_v55, 0.0 }
  0x1d   : > { %769 = vmatprep.mubr.msk.f32.mxu0 %vm318_vm1, %v305_v42  ;;  %778 = vmatprep.mubr.msk.f32.mxu1 %vm318_vm1, %v311_v51  ;;  %v314_v63 = vmax.f32 %v298_v58, 0.0  ;;  %v300_v0 = vadd.f32 %v867_v2, %v277_v59 }
  0x1e   : > { %v315_v3 = vmax.f32 %v299_v61, 0.0 }
  0x1f   : > { %v316_v1 = vmax.f32 %v300_v0, 0.0 }
  0x20   : > { %770 = vmatmul.mubr.msk.f32.gmra.mrb[4].mxu0 %vm318_vm1, %v306_v54  ;;  %779 = vmatmul.mubr.msk.f32.gmra.mrb[2].mxu1 %vm318_vm1, %v312_v57 }
  0x21   : > { %772 = vmatprep.mubr.msk.f32.mxu0 %vm318_vm1, %v307_v56  ;;  %781 = vmatprep.mubr.msk.f32.mxu1 %vm318_vm1, %v313_v60 }
  0x24   : > { %773 = vmatmul.mubr.msk.f32.gmra.mrb[6].mxu0 %vm318_vm1, %v308_v62  ;;  %782 = vmatmul.mubr.msk.f32.gmra.mrb[4].mxu1 %vm318_vm1, %v314_v63 }
  0x25   : > { %784 = vmatprep.mubr.msk.f32.mxu1 %vm318_vm1, %v315_v3 }
  0x28   : > { %785 = vmatmul.mubr.msk.f32.gmra.mrb[6].mxu1 %vm318_vm1, %v316_v1 }
  0xeb   : > { %v765_v2 = vpop.f32.mrb[0].mxu0 }
  0xec   : > { %518 = vst.msk [vmem:[%s938_s8 + $0x8] sm:$0xff] %vm516_vm2, %v765_v2  ;;  %v534_v4 = vsel %vm516_vm2, %v765_v2, 0.0  ;;  %v573_v5 = vmul.f32 %v765_v2, %v765_v2  ;;  %v437_v6 = vpop.f32.mrb[1].mxu0 }
  0xed   : > { %517 = vst.msk [vmem:[%s938_s8] sm:$0xff] %vm516_vm2, %v437_v6  ;;  %v533_v7 = vsel %vm516_vm2, %v437_v6, 0.0  ;;  %v572_v8 = vmul.f32 %v437_v6, %v437_v6 }
  0xee   : > { %v589_v9 = vsel %vm516_vm2, %v573_v5, 0.0  ;;  %v535_v10 = vadd.f32 %v534_v4, %v533_v7 }
  0xef   : > { %v588_v11 = vsel %vm516_vm2, %v572_v8, 0.0  ;;  %v768_v12 = vpop.f32.mrb[2].mxu0  ;;  %v777_v18 = vpop.f32.mrb[0].mxu1 }
  0xf0   : > { %v590_v13 = vadd.f32 %v589_v9, %v588_v11  ;;  %520 = vst.msk [vmem:[%s938_s8 + $0x18] sm:$0xff] %vm516_vm2, %v768_v12  ;;  %v447_v14 = vpop.f32.mrb[3].mxu0  ;;  %v575_v15 = vmul.f32 %v768_v12, %v768_v12  ;;  %526 = vst.msk [vmem:[%s938_s8 + $0x48] sm:$0xff] %vm516_vm2, %v777_v18  ;;  %v477_v20 = vpop.f32.mrb[1].mxu1  ;;  %v538_v21 = vsel %vm516_vm2, %v768_v12, 0.0  ;;  %v581_v56 = vmul.f32 %v777_v18, %v777_v18 }
  0xf1   : > { %519 = vst.msk [vmem:[%s938_s8 + $0x10] sm:$0xff] %vm516_vm2, %v447_v14  ;;  %v536_v16 = vsel %vm516_vm2, %v447_v14, 0.0  ;;  %v574_v17 = vmul.f32 %v447_v14, %v447_v14  ;;  %525 = vst.msk [vmem:[%s938_s8 + $0x40] sm:$0xff] %vm516_vm2, %v477_v20  ;;  %v580_v41 = vmul.f32 %v477_v20, %v477_v20  ;;  %v548_v52 = vsel %vm516_vm2, %v477_v20, 0.0 }
  0xf2   : > { %v537_v19 = vadd.f32 %v536_v16, %v535_v10  ;;  %v593_v27 = vsel %vm516_vm2, %v575_v15, 0.0  ;;  %v550_v63 = vsel %vm516_vm2, %v777_v18, 0.0  ;;  %v605_v2 = vsel %vm516_vm2, %v581_v56, 0.0 }
  0xf3   : > { %v591_v22 = vsel %vm516_vm2, %v574_v17, 0.0  ;;  %v771_v23 = vpop.f32.mrb[4].mxu0  ;;  %v780_v31 = vpop.f32.mrb[2].mxu1  ;;  %v603_v57 = vsel %vm516_vm2, %v580_v41, 0.0 }
  0xf4   : > { %v592_v24 = vadd.f32 %v591_v22, %v590_v13  ;;  %522 = vst.msk [vmem:[%s938_s8 + $0x28] sm:$0xff] %vm516_vm2, %v771_v23  ;;  %v457_v25 = vpop.f32.mrb[5].mxu0  ;;  %v539_v26 = vadd.f32 %v538_v21, %v537_v19  ;;  %v577_v28 = vmul.f32 %v771_v23, %v771_v23  ;;  %528 = vst.msk [vmem:[%s938_s8 + $0x58] sm:$0xff] %vm516_vm2, %v780_v31  ;;  %v487_v34 = vpop.f32.mrb[3].mxu1  ;;  %v542_v35 = vsel %vm516_vm2, %v771_v23, 0.0 }
  0xf5   : > { %521 = vst.msk [vmem:[%s938_s8 + $0x20] sm:$0xff] %vm516_vm2, %v457_v25  ;;  %v540_v29 = vsel %vm516_vm2, %v457_v25, 0.0  ;;  %v576_v30 = vmul.f32 %v457_v25, %v457_v25  ;;  %527 = vst.msk [vmem:[%s938_s8 + $0x50] sm:$0xff] %vm516_vm2, %v487_v34  ;;  %v582_v58 = vmul.f32 %v487_v34, %v487_v34  ;;  %v552_v0 = vsel %vm516_vm2, %v487_v34, 0.0 }
  0xf6   : > { %v541_v32 = vadd.f32 %v540_v29, %v539_v26  ;;  %v594_v33 = vadd.f32 %v593_v27, %v592_v24  ;;  %v597_v42 = vsel %vm516_vm2, %v577_v28, 0.0  ;;  %v583_v4 = vmul.f32 %v780_v31, %v780_v31 }
  0xf7   : > { %v595_v36 = vsel %vm516_vm2, %v576_v30, 0.0  ;;  %v774_v37 = vpop.f32.mrb[6].mxu0  ;;  %v783_v46 = vpop.f32.mrb[4].mxu1  ;;  %v607_v5 = vsel %vm516_vm2, %v582_v58, 0.0  ;;  %v554_v9 = vsel %vm516_vm2, %v780_v31, 0.0 }
  0xf8   : > { %v596_v38 = vadd.f32 %v595_v36, %v594_v33  ;;  %524 = vst.msk [vmem:[%s938_s8 + $0x38] sm:$0xff] %vm516_vm2, %v774_v37  ;;  %v467_v39 = vpop.f32.mrb[7].mxu0  ;;  %v543_v40 = vadd.f32 %v542_v35, %v541_v32  ;;  %v579_v43 = vmul.f32 %v774_v37, %v774_v37  ;;  %530 = vst.msk [vmem:[%s938_s8 + $0x68] sm:$0xff] %vm516_vm2, %v783_v46  ;;  %v497_v49 = vpop.f32.mrb[5].mxu1  ;;  %v546_v50 = vsel %vm516_vm2, %v774_v37, 0.0 }
  0xf9   : > { %523 = vst.msk [vmem:[%s938_s8 + $0x30] sm:$0xff] %vm516_vm2, %v467_v39  ;;  %v544_v44 = vsel %vm516_vm2, %v467_v39, 0.0  ;;  %v578_v45 = vmul.f32 %v467_v39, %v467_v39  ;;  %529 = vst.msk [vmem:[%s938_s8 + $0x60] sm:$0xff] %vm516_vm2, %v497_v49  ;;  %v584_v6 = vmul.f32 %v497_v49, %v497_v49  ;;  %v556_v10 = vsel %vm516_vm2, %v497_v49, 0.0 }
  0xfa   : > { %v545_v47 = vadd.f32 %v544_v44, %v543_v40  ;;  %v598_v48 = vadd.f32 %v597_v42, %v596_v38  ;;  %v601_v55 = vsel %vm516_vm2, %v579_v43, 0.0  ;;  %v609_v13 = vsel %vm516_vm2, %v583_v4, 0.0 }
  0xfb   : > { %v599_v51 = vsel %vm516_vm2, %v578_v45, 0.0  ;;  %v786_v59 = vpop.f32.mrb[6].mxu1  ;;  %v585_v14 = vmul.f32 %v783_v46, %v783_v46  ;;  %v611_v15 = vsel %vm516_vm2, %v584_v6, 0.0  ;;  %v558_v19 = vsel %vm516_vm2, %v783_v46, 0.0 }
  0xfc   : > { %v547_v53 = vadd.f32 %v546_v50, %v545_v47  ;;  %v600_v54 = vadd.f32 %v599_v51, %v598_v48  ;;  %532 = vst.msk [vmem:[%s938_s8 + $0x78] sm:$0xff] %vm516_vm2, %v786_v59  ;;  %v507_v62 = vpop.f32.mrb[7].mxu1  ;;  %v587_v24 = vmul.f32 %v786_v59, %v786_v59  ;;  %v562_v28 = vsel %vm516_vm2, %v786_v59, 0.0 }
  0xfd   : > { %531 = vst.msk [vmem:[%s938_s8 + $0x70] sm:$0xff] %vm516_vm2, %v507_v62  ;;  %v586_v16 = vmul.f32 %v507_v62, %v507_v62  ;;  %v560_v20 = vsel %vm516_vm2, %v507_v62, 0.0  ;;  %v613_v23 = vsel %vm516_vm2, %v585_v14, 0.0 }
  0xfe   : > { %v602_v60 = vadd.f32 %v601_v55, %v600_v54  ;;  %v549_v61 = vadd.f32 %v548_v52, %v547_v53  ;;  %v617_v31 = vsel %vm516_vm2, %v587_v24, 0.0 }
  0xff   : > { %v615_v25 = vsel %vm516_vm2, %v586_v16, 0.0 }
 0x100   : > { %v604_v3 = vadd.f32 %v603_v57, %v602_v60  ;;  %v551_v1 = vadd.f32 %v550_v63, %v549_v61 }
 0x102   : > { %v553_v7 = vadd.f32 %v552_v0, %v551_v1  ;;  %v606_v8 = vadd.f32 %v605_v2, %v604_v3 }
 0x104   : > { %v608_v11 = vadd.f32 %v607_v5, %v606_v8  ;;  %v555_v12 = vadd.f32 %v554_v9, %v553_v7 }
 0x106   : > { %v557_v17 = vadd.f32 %v556_v10, %v555_v12  ;;  %v610_v18 = vadd.f32 %v609_v13, %v608_v11 }
 0x108   : > { %v612_v21 = vadd.f32 %v611_v15, %v610_v18  ;;  %v559_v22 = vadd.f32 %v558_v19, %v557_v17 }
 0x10a   : > { %v561_v26 = vadd.f32 %v560_v20, %v559_v22  ;;  %v614_v27 = vadd.f32 %v613_v23, %v612_v21 }
 0x10c   : > { %v563_v29 = vadd.f32 %v562_v28, %v561_v26  ;;  %v616_v30 = vadd.f32 %v615_v25, %v614_v27 }
 0x10e   : > { %v564_v32 = vrot.slane %v563_v29, 4  ;;  %v618_v33 = vadd.f32 %v617_v31, %v616_v30 }
 0x110   : > { %v565_v34 = vadd.f32 %v564_v32, %v563_v29  ;;  %v619_v35 = vrot.slane %v618_v33, 4 }
 0x112   : > { %v566_v36 = vrot.slane %v565_v34, 2  ;;  %v620_v37 = vadd.f32 %v619_v35, %v618_v33 }
 0x114   : > { %v567_v38 = vadd.f32 %v566_v36, %v565_v34  ;;  %v621_v39 = vrot.slane %v620_v37, 2 }
 0x116   : > { %v568_v40 = vrot.slane %v567_v38, 1  ;;  %v622_v41 = vadd.f32 %v621_v39, %v620_v37 }
 0x118   : > { %v569_v42 = vadd.f32 %v568_v40, %v567_v38  ;;  %v623_v43 = vrot.slane %v622_v41, 1 }
 0x11a   : > { %571 = vst.msk [vmem:[%s238_s12] sm:$0x1] %vm570_vm3, %v569_v42  ;;  %v624_v44 = vadd.f32 %v623_v43, %v622_v41 }
 0x11c   : > { %625 = vst.msk [vmem:[%s238_s12 + $0x1] sm:$0x1] %vm570_vm3, %v624_v44 }
 0x11d PF: > { %s16_s18 = sadd.s32 1, %s803_s18  }
 0x11e   : > { %p13_p5 = scmp.ge.s32.totalorder %s16_s18, 6  }
 0x120   :  { %15 = sbr.rel (!%p13_p5) target bundleno = 1 (0x1), region = 78 }

</bundles_post_ra>
